<compile_context>
chip_gen: v7x
topology: tpu7x:2x2x1
jax: 0.10.0
libtpu: 0.0.40
codegen_flags: <defaults>
</compile_context>

<pallas_src>
import functools

import jax
import jax.numpy as jnp
from jax.experimental import pallas as pl
from jax.experimental.pallas import tpu as pltpu


def _round_up(x, m):
    return (x + m - 1) // m * m


def _cdiv(a, b):
    return -(-a // b)


def _actor_kernel(n_hidden_linear, state_dim, *refs):
    """Whole fused MLP for one batch tile, everything resident in VMEM.

    refs = (s_pad, z, w1, b1, [w_h, b_h] * n_hidden_linear, w_out, b_out, out)
    Weights are bf16; matmul accumulation, bias add, ReLU and softmax are f32.
    """
    s_ref, z_ref, w1_ref, b1_ref = refs[:4]
    out_ref = refs[-1]
    rest = refs[4:-1]
    tb, k_pad = s_ref.shape

    # Layer 0: concat([s, one_hot(z)]) @ W1 as a single MXU dot.
    # s_ref is zero-padded in columns >= state_dim by the wrapper, so adding a
    # one-hot at column (state_dim + z) reconstructs the concatenation exactly.
    x = s_ref[...].astype(jnp.bfloat16)
    ids = jax.lax.broadcasted_iota(jnp.int32, (tb, k_pad), 1)
    x = x + (ids == (z_ref[...] + state_dim)).astype(jnp.bfloat16)

    h = jnp.dot(x, w1_ref[...], preferred_element_type=jnp.float32) + b1_ref[...]
    h = jnp.maximum(h, 0.0)

    # hidden Linear + ReLU layers
    for layer in range(n_hidden_linear):
        w_ref = rest[2 * layer]
        b_ref = rest[2 * layer + 1]
        h = jnp.dot(h.astype(jnp.bfloat16), w_ref[...],
                    preferred_element_type=jnp.float32) + b_ref[...]
        h = jnp.maximum(h, 0.0)

    # output layer (lane-padded to a multiple of 128; padded cols have bias -1e30)
    wout_ref, bout_ref = rest[-2], rest[-1]
    logits = jnp.dot(h.astype(jnp.bfloat16), wout_ref[...],
                     preferred_element_type=jnp.float32) + bout_ref[...]

    # numerically-stable softmax; padded lanes contribute exp(-1e30 - m) == 0 exactly
    m = jnp.max(logits, axis=-1, keepdims=True)
    e = jnp.exp(logits - m)
    denom = jnp.sum(e, axis=-1, keepdims=True)
    out_ref[...] = (e * pl.reciprocal(denom, approx=False)).astype(out_ref.dtype)


def prepare_actor_params(params, state_dim, lane=128, k_align=16):
    """Convert (in, out)-layout f32 params to the kernel's layout (call once).

    - layer-0 weight kept pre-concatenated, rows zero-padded to a multiple of 16
      (bf16 sublane packing) so the kernel does a single fused dot
    - weights -> bf16, biases -> (1, out) f32
    - output layer padded to a lane-dense width; padded logits get bias -1e30
      so softmax assigns them exactly zero probability.
    """
    w0, b0 = params[0]
    in_dim = w0.shape[0]                       # state_dim + strategy_num
    strategy_num = in_dim - state_dim
    k_pad = max(k_align, _round_up(in_dim, k_align))
    w1 = jnp.zeros((k_pad, w0.shape[1]), jnp.bfloat16)
    w1 = w1.at[:in_dim].set(w0.astype(jnp.bfloat16))
    b1 = b0.reshape(1, -1).astype(jnp.float32)

    hidden = tuple((w.astype(jnp.bfloat16), b.reshape(1, -1).astype(jnp.float32))
                   for w, b in params[1:-1])

    w_out, b_out = params[-1]
    action_dim = w_out.shape[1]
    pad_a = max(lane, _round_up(action_dim, lane))
    w_out_p = jnp.zeros((w_out.shape[0], pad_a), jnp.bfloat16)
    w_out_p = w_out_p.at[:, :action_dim].set(w_out.astype(jnp.bfloat16))
    b_out_p = jnp.full((1, pad_a), -1e30, jnp.float32)
    b_out_p = b_out_p.at[0, :action_dim].set(b_out.astype(jnp.float32))

    return dict(w1=w1, b1=b1, hidden=hidden, w_out=w_out_p, b_out=b_out_p,
                state_dim=state_dim, strategy_num=strategy_num, k_pad=k_pad,
                action_dim=action_dim, pad_a=pad_a)


def conditional_actor_forward(s, z, kparams, *, block_batch=2048,
                              out_dtype=jnp.bfloat16, trim=False):
    """Batch-tiled Pallas call: activations stream, weights stay VMEM-resident.

    Returns (probs, None).  With trim=False (default, recommended) probs has shape
    (padded_batch, pad_a): lanes >= action_dim are exactly 0, rows >= batch must be
    ignored by the caller (avoids an extra strided-slice HBM pass).  With trim=True
    probs is sliced to (batch, action_dim).
    """
    batch = s.shape[0]
    state_dim = kparams["state_dim"]
    k_pad = kparams["k_pad"]
    pad_a = kparams["pad_a"]
    hidden_w = kparams["w1"].shape[1]

    s2 = s.reshape(batch, -1)                  # keep caller dtype (f32 or bf16)
    assert s2.shape[1] == state_dim, "state_dim mismatch with prepared params"

    # --- batch tile selection -------------------------------------------------
    # Even out tiles to minimize padding, and keep >= 2 grid steps when the batch
    # allows it so the "parallel" axis can shard across both v7x TensorCores.
    pb8 = _round_up(batch, 8)
    n_steps = max(1, _cdiv(pb8, min(block_batch, pb8)))
    if pb8 >= 16:
        n_steps = max(n_steps, 2)
    tb = _round_up(_cdiv(pb8, n_steps), 8)
    padded_batch = tb * n_steps

    # One fused pad: batch rows + K columns (zeroed columns host the one-hot slot).
    s2 = jnp.pad(s2, ((0, padded_batch - batch), (0, k_pad - state_dim)))
    z2 = jnp.pad(z.astype(jnp.int32), (0, padded_batch - batch)).reshape(padded_batch, 1)

    n_hidden_linear = len(kparams["hidden"])
    kernel = functools.partial(_actor_kernel, n_hidden_linear, state_dim)

    resident_map = lambda i: (0, 0)   # weights/biases: same block every grid step
    tiled_map = lambda i: (i, 0)      # activations/output: tiled over batch

    resident_arrays = ([kparams["w1"], kparams["b1"]]
                       + [a for wb in kparams["hidden"] for a in wb]
                       + [kparams["w_out"], kparams["b_out"]])
    resident_bytes = sum(int(a.nbytes) for a in resident_arrays)
    # Only worth single-buffering the resident weights once they are big enough
    # to matter against v7x's 64 MiB VMEM (at hidden=128 they are ~100 KB: noise).
    single_buffer_weights = resident_bytes > (2 << 20)

    def resident_spec(shape):
        if single_buffer_weights:
            try:
                return pl.BlockSpec(shape, resident_map, pipeline_mode=pl.Buffered(1))
            except Exception:
                pass
        return pl.BlockSpec(shape, resident_map)

    in_specs = [
        pl.BlockSpec((tb, k_pad), tiled_map),                # s (zero-padded cols)
        pl.BlockSpec((tb, 1), tiled_map),                    # z
        resident_spec(kparams["w1"].shape),
        resident_spec(kparams["b1"].shape),
    ]
    operands = [s2, z2, kparams["w1"], kparams["b1"]]
    for w, b in kparams["hidden"]:
        in_specs += [resident_spec(w.shape), resident_spec(b.shape)]
        operands += [w, b]
    in_specs += [resident_spec(kparams["w_out"].shape),
                 resident_spec(kparams["b_out"].shape)]
    operands += [kparams["w_out"], kparams["b_out"]]

    # Rough VMEM budget: double-buffered streamed tiles + resident weights + live
    # f32 activations.  Only raise the scoped limit when we would exceed v5e's
    # 16 MiB default (keeps the common case on compiler defaults).
    out_itemsize = jnp.dtype(out_dtype).itemsize
    vmem_est = (2 * (tb * k_pad * s2.dtype.itemsize + tb * 4)      # s, z in
                + 2 * tb * pad_a * out_itemsize                    # out
                + 3 * tb * max(hidden_w, pad_a) * 4                # live activations
                + resident_bytes * (1 if single_buffer_weights else 2))
    compiler_kwargs = dict(dimension_semantics=("parallel",))      # megacore on v7x
    if vmem_est > (16 << 20):
        compiler_kwargs["vmem_limit_bytes"] = min(int(vmem_est * 1.5), 48 << 20)

    out = pl.pallas_call(
        kernel,
        out_shape=jax.ShapeDtypeStruct((padded_batch, pad_a), out_dtype),
        grid_spec=pltpu.PrefetchScalarGridSpec(
            num_scalar_prefetch=0,
            grid=(n_steps,),
            in_specs=in_specs,
            out_specs=pl.BlockSpec((tb, pad_a), tiled_map),
        ),
        compiler_params=pltpu.CompilerParams(**compiler_kwargs),
    )(*operands)

    if trim:
        out = out[:batch, :kparams["action_dim"]]
    return out, None


def init_conditional_actor_params(key, layer_num, state_dim, strategy_num,
                                  action_dim, hidden_units):
    """Orthogonal weights (as in torch.nn.init.orthogonal_), zero biases, f32."""
    in_dim = state_dim + strategy_num
    dims = [in_dim] + [hidden_units] * layer_num + [action_dim]
    ortho = jax.nn.initializers.orthogonal()
    params = []
    for i in range(len(dims) - 1):
        key, sub = jax.random.split(key)
        w = ortho(sub, (dims[i], dims[i + 1]), jnp.float32)   # stored (in, out)
        bias = jnp.zeros((dims[i + 1],), jnp.float32)
        params.append((w, bias))
    return params


def _reference_forward(s, z, params, strategy_num):
    """Pure-JAX f32 reference matching the PyTorch module."""
    batch = s.shape[0]
    x = jnp.concatenate(
        [s.reshape(batch, -1).astype(jnp.float32),
         jax.nn.one_hot(z, strategy_num, dtype=jnp.float32)], axis=1)
    h = x
    for i, (w, b) in enumerate(params):
        h = h @ w + b
        if i < len(params) - 1:
            h = jnp.maximum(h, 0.0)
    return jax.nn.softmax(h, axis=-1)


if __name__ == "__main__":
    # Small, forward-consistent shapes (hidden_units=128 is the module default).
    layer_num = 2          # -> 2 hidden Linear+ReLU layers + output Linear
    state_dim = 16         # prod(state_shape)
    strategy_num = 4
    action_dim = 4         # prod(action_shape)
    hidden_units = 128

    key = jax.random.PRNGKey(0)
    k_s, k_z, k_p, k_s2, k_z2 = jax.random.split(key, 5)

    params = init_conditional_actor_params(
        k_p, layer_num, state_dim, strategy_num, action_dim, hidden_units)
    kparams = prepare_actor_params(params, state_dim)

    # --- tiny batch (grid = 1 step) ---
    batch = 2
    s = jax.random.normal(k_s, (batch, state_dim), dtype=jnp.float32)
    z = jax.random.randint(k_z, (batch,), 0, strategy_num)

    probs_padded, _ = conditional_actor_forward(s, z, kparams)
    probs_padded = jax.block_until_ready(probs_padded)
    ref = _reference_forward(s, z, params, strategy_num)

    probs = probs_padded[:batch, :action_dim].astype(jnp.float32)  # consumer-side view
    assert probs_padded.shape[1] == kparams["pad_a"]
    assert bool(jnp.all(probs_padded[:batch, action_dim:] == 0))   # padded lanes exact 0
    assert jnp.allclose(jnp.sum(probs, axis=-1), 1.0, atol=2e-2)
    assert jnp.allclose(probs, ref, atol=5e-2)

    # --- non-multiple batch (exercises >=2 grid steps + tile balancing) ---
    batch2 = 300
    s2 = jax.random.normal(k_s2, (batch2, state_dim), dtype=jnp.float32)
    z2 = jax.random.randint(k_z2, (batch2,), 0, strategy_num)
    probs2_padded, _ = conditional_actor_forward(s2, z2, kparams)
    probs2_padded = jax.block_until_ready(probs2_padded)
    ref2 = _reference_forward(s2, z2, params, strategy_num)
    probs2 = probs2_padded[:batch2, :action_dim].astype(jnp.float32)
    assert jnp.allclose(jnp.sum(probs2, axis=-1), 1.0, atol=2e-2)
    assert jnp.allclose(probs2, ref2, atol=5e-2)

    print("KERNEL_OK")
</pallas_src>

<mosaic_0001>
module attributes {stable_mosaic.version = 11 : i64} {
  func.func @_actor_kernel(%arg0: i32, %arg1: memref<8x32xf32, #tpu.memory_space<vmem>>, %arg2: memref<8x1xi32, #tpu.memory_space<vmem>>, %arg3: memref<32x128xbf16, #tpu.memory_space<vmem>>, %arg4: memref<1x128xf32, #tpu.memory_space<vmem>>, %arg5: memref<128x128xbf16, #tpu.memory_space<vmem>>, %arg6: memref<1x128xf32, #tpu.memory_space<vmem>>, %arg7: memref<128x128xbf16, #tpu.memory_space<vmem>>, %arg8: memref<1x128xf32, #tpu.memory_space<vmem>>, %arg9: memref<8x128xbf16, #tpu.memory_space<vmem>>) attributes {dimension_semantics = [#tpu.dimension_semantics<parallel>], iteration_bounds = array<i64: 1>, scalar_prefetch = 0 : i64, scratch_operands = 0 : i64, tpu.core_type = #tpu.core_type<tc>, window_params = [{transform_indices = @transform_0, window_bounds = array<i64: 8, 32>}, {transform_indices = @transform_1, window_bounds = array<i64: 8, 1>}, {pipeline_mode = #tpu.pipeline_mode<synchronous>, transform_indices = @transform_2, window_bounds = array<i64: 32, 128>}, {pipeline_mode = #tpu.pipeline_mode<synchronous>, transform_indices = @transform_3, window_bounds = array<i64: 1, 128>}, {pipeline_mode = #tpu.pipeline_mode<synchronous>, transform_indices = @transform_4, window_bounds = array<i64: 128, 128>}, {pipeline_mode = #tpu.pipeline_mode<synchronous>, transform_indices = @transform_5, window_bounds = array<i64: 1, 128>}, {pipeline_mode = #tpu.pipeline_mode<synchronous>, transform_indices = @transform_6, window_bounds = array<i64: 128, 128>}, {pipeline_mode = #tpu.pipeline_mode<synchronous>, transform_indices = @transform_7, window_bounds = array<i64: 1, 128>}, {transform_indices = @transform_8, window_bounds = array<i64: 8, 128>}]} {
    %c0 = arith.constant 0 : index
    %c0_0 = arith.constant 0 : index
    %0 = vector.load %arg1[%c0, %c0_0] : memref<8x32xf32, #tpu.memory_space<vmem>>, vector<8x32xf32>
    %1 = arith.truncf %0 : vector<8x32xf32> to vector<8x32xbf16>
    %2 = tpu.iota {dimensions = array<i32: 1>} : vector<8x32xi32>
    %c0_1 = arith.constant 0 : index
    %c0_2 = arith.constant 0 : index
    %3 = vector.load %arg2[%c0_1, %c0_2] : memref<8x1xi32, #tpu.memory_space<vmem>>, vector<8x1xi32>
    %c16_i32 = arith.constant 16 : i32
    %4 = vector.broadcast %c16_i32 : i32 to vector<8x1xi32>
    %5 = arith.addi %3, %4 : vector<8x1xi32>
    %6 = vector.broadcast %5 : vector<8x1xi32> to vector<8x32xi32>
    %7 = arith.cmpi eq, %2, %6 : vector<8x32xi32>
    %8 = arith.extui %7 : vector<8x32xi1> to vector<8x32xi32>
    %9 = arith.sitofp %8 : vector<8x32xi32> to vector<8x32xf32>
    %10 = arith.truncf %9 : vector<8x32xf32> to vector<8x32xbf16>
    %11 = arith.addf %1, %10 : vector<8x32xbf16>
    %c0_3 = arith.constant 0 : index
    %c0_4 = arith.constant 0 : index
    %12 = vector.load %arg3[%c0_3, %c0_4] : memref<32x128xbf16, #tpu.memory_space<vmem>>, vector<32x128xbf16>
    %cst = arith.constant dense<0.000000e+00> : vector<8x128xf32>
    %13 = tpu.matmul %11, %12, %cst {dimension_numbers = #tpu.dot_dimension_numbers<[1], [0], [0], [1], [0, 0, 1, 1], [], []>} : vector<8x32xbf16>, vector<32x128xbf16>, vector<8x128xf32> -> vector<8x128xf32>
    %c0_5 = arith.constant 0 : index
    %c0_6 = arith.constant 0 : index
    %14 = vector.load %arg4[%c0_5, %c0_6] : memref<1x128xf32, #tpu.memory_space<vmem>>, vector<1x128xf32>
    %15 = vector.broadcast %14 : vector<1x128xf32> to vector<8x128xf32>
    %16 = arith.addf %13, %15 : vector<8x128xf32>
    %cst_7 = arith.constant 0.000000e+00 : f32
    %17 = vector.broadcast %cst_7 : f32 to vector<8x128xf32>
    %18 = arith.maximumf %16, %17 : vector<8x128xf32>
    %19 = arith.truncf %18 : vector<8x128xf32> to vector<8x128xbf16>
    %c0_8 = arith.constant 0 : index
    %c0_9 = arith.constant 0 : index
    %20 = vector.load %arg5[%c0_8, %c0_9] : memref<128x128xbf16, #tpu.memory_space<vmem>>, vector<128x128xbf16>
    %cst_10 = arith.constant dense<0.000000e+00> : vector<8x128xf32>
    %21 = tpu.matmul %19, %20, %cst_10 {dimension_numbers = #tpu.dot_dimension_numbers<[1], [0], [0], [1], [0, 0, 1, 1], [], []>} : vector<8x128xbf16>, vector<128x128xbf16>, vector<8x128xf32> -> vector<8x128xf32>
    %c0_11 = arith.constant 0 : index
    %c0_12 = arith.constant 0 : index
    %22 = vector.load %arg6[%c0_11, %c0_12] : memref<1x128xf32, #tpu.memory_space<vmem>>, vector<1x128xf32>
    %23 = vector.broadcast %22 : vector<1x128xf32> to vector<8x128xf32>
    %24 = arith.addf %21, %23 : vector<8x128xf32>
    %cst_13 = arith.constant 0.000000e+00 : f32
    %25 = vector.broadcast %cst_13 : f32 to vector<8x128xf32>
    %26 = arith.maximumf %24, %25 : vector<8x128xf32>
    %27 = arith.truncf %26 : vector<8x128xf32> to vector<8x128xbf16>
    %c0_14 = arith.constant 0 : index
    %c0_15 = arith.constant 0 : index
    %28 = vector.load %arg7[%c0_14, %c0_15] : memref<128x128xbf16, #tpu.memory_space<vmem>>, vector<128x128xbf16>
    %cst_16 = arith.constant dense<0.000000e+00> : vector<8x128xf32>
    %29 = tpu.matmul %27, %28, %cst_16 {dimension_numbers = #tpu.dot_dimension_numbers<[1], [0], [0], [1], [0, 0, 1, 1], [], []>} : vector<8x128xbf16>, vector<128x128xbf16>, vector<8x128xf32> -> vector<8x128xf32>
    %c0_17 = arith.constant 0 : index
    %c0_18 = arith.constant 0 : index
    %30 = vector.load %arg8[%c0_17, %c0_18] : memref<1x128xf32, #tpu.memory_space<vmem>>, vector<1x128xf32>
    %31 = vector.broadcast %30 : vector<1x128xf32> to vector<8x128xf32>
    %32 = arith.addf %29, %31 : vector<8x128xf32>
    %cst_19 = arith.constant dense<0xFF800000> : vector<8xf32>
    %33 = vector.multi_reduction <maximumf>, %32, %cst_19 [1] : vector<8x128xf32> to vector<8xf32>
    %34 = vector.shape_cast %33 : vector<8xf32> to vector<8x1xf32>
    %35 = vector.broadcast %34 : vector<8x1xf32> to vector<8x128xf32>
    %36 = arith.subf %32, %35 : vector<8x128xf32>
    %37 = math.exp %36 : vector<8x128xf32>
    %cst_20 = arith.constant dense<0.000000e+00> : vector<8xf32>
    %38 = vector.multi_reduction <add>, %37, %cst_20 [1] : vector<8x128xf32> to vector<8xf32>
    %39 = vector.shape_cast %38 : vector<8xf32> to vector<8x1xf32>
    %40 = tpu.reciprocal %39 : vector<8x1xf32> -> vector<8x1xf32>
    %41 = vector.broadcast %40 : vector<8x1xf32> to vector<8x128xf32>
    %42 = arith.mulf %37, %41 : vector<8x128xf32>
    %43 = arith.truncf %42 : vector<8x128xf32> to vector<8x128xbf16>
    %c0_21 = arith.constant 0 : index
    %c0_22 = arith.constant 0 : index
    %44 = vector.load %arg9[%c0_21, %c0_22] : memref<8x128xbf16, #tpu.memory_space<vmem>>, vector<8x128xbf16>
    tpu.vector_store %arg9[%c0_21, %c0_22], %43 {strides = array<i32>} : memref<8x128xbf16, #tpu.memory_space<vmem>>, vector<8x128xbf16>,
    return
  }
  func.func @transform_0(%arg0: i32) -> (i32, i32) {
    %c0_i32 = arith.constant 0 : i32
    %c0_i32_0 = arith.constant 0 : i32
    return %arg0, %c0_i32 : i32, i32
  }
  func.func @transform_1(%arg0: i32) -> (i32, i32) {
    %c0_i32 = arith.constant 0 : i32
    %c0_i32_0 = arith.constant 0 : i32
    return %arg0, %c0_i32 : i32, i32
  }
  func.func @transform_2(%arg0: i32) -> (i32, i32) {
    %c0_i32 = arith.constant 0 : i32
    %c0_i32_0 = arith.constant 0 : i32
    %c0_i32_1 = arith.constant 0 : i32
    return %c0_i32, %c0_i32_0 : i32, i32
  }
  func.func @transform_3(%arg0: i32) -> (i32, i32) {
    %c0_i32 = arith.constant 0 : i32
    %c0_i32_0 = arith.constant 0 : i32
    %c0_i32_1 = arith.constant 0 : i32
    return %c0_i32, %c0_i32_0 : i32, i32
  }
  func.func @transform_4(%arg0: i32) -> (i32, i32) {
    %c0_i32 = arith.constant 0 : i32
    %c0_i32_0 = arith.constant 0 : i32
    %c0_i32_1 = arith.constant 0 : i32
    return %c0_i32, %c0_i32_0 : i32, i32
  }
  func.func @transform_5(%arg0: i32) -> (i32, i32) {
    %c0_i32 = arith.constant 0 : i32
    %c0_i32_0 = arith.constant 0 : i32
    %c0_i32_1 = arith.constant 0 : i32
    return %c0_i32, %c0_i32_0 : i32, i32
  }
  func.func @transform_6(%arg0: i32) -> (i32, i32) {
    %c0_i32 = arith.constant 0 : i32
    %c0_i32_0 = arith.constant 0 : i32
    %c0_i32_1 = arith.constant 0 : i32
    return %c0_i32, %c0_i32_0 : i32, i32
  }
  func.func @transform_7(%arg0: i32) -> (i32, i32) {
    %c0_i32 = arith.constant 0 : i32
    %c0_i32_0 = arith.constant 0 : i32
    %c0_i32_1 = arith.constant 0 : i32
    return %c0_i32, %c0_i32_0 : i32, i32
  }
  func.func @transform_8(%arg0: i32) -> (i32, i32) {
    %c0_i32 = arith.constant 0 : i32
    %c0_i32_0 = arith.constant 0 : i32
    return %arg0, %c0_i32 : i32, i32
  }
}

</mosaic_0001>

<bundles_post_ra>
// kernel: tpu_custom_call.1
= control target key start
LH: loop header
LB: loop body
LE: loop exit
PB: predicated region body
PF: predicated region fallthrough
CT: control target
= control target key end

     0   :  { %13 = vsyncpa [#allocation3], 0  ;;  %s773_s0 = inlined_call_operand.hbm [shape: f32[8,32], index: 0, kind: input, shape index: {}]   ;;  %s774_s1 = inlined_call_operand.vmem [shape: s32[8,1], index: 1, kind: input, shape index: {}]   ;;  %s775_s2 = inlined_call_operand.vmem [shape: bf16[32,128], index: 2, kind: input, shape index: {}]   ;;  %s776_s3 = inlined_call_operand.vmem [shape: f32[1,128], index: 3, kind: input, shape index: {}]   ;;  %s777_s4 = inlined_call_operand.hbm [shape: bf16[128,128], index: 4, kind: input, shape index: {}]   ;;  %s778_s5 = inlined_call_operand.vmem [shape: f32[1,128], index: 5, kind: input, shape index: {}]   ;;  %s779_s6 = inlined_call_operand.hbm [shape: bf16[128,128], index: 6, kind: input, shape index: {}]   ;;  %s780_s7 = inlined_call_operand.vmem [shape: f32[1,128], index: 7, kind: input, shape index: {}]   ;;  %s781_s8 = inlined_call_operand.hbm [shape: bf16[8,128], index: 8, kind: output, shape index: {}]  }
   0x1   :  { %14 = vsyncpa [#allocation6], 0 }
   0x2   :  { %15 = vsyncpa [#allocation4], 0  ;;  %s622_s27 = smov [#allocation5]   ;;  %s528_s9 = scalar_lea.hbm %s777_s4, 1024 }
   0x3   :  { %s37_s28 = sshll.u32 %s622_s27, 4  ;;  %p529_p0 = scmp.ne.s32.totalorder %s777_s4, %s528_s9  ;;  %s38_s28 = int_to_ptr.vmem [resolvable:$true] %s37_s28 }
   0x4   :  { %p532_p1 = scmp.lt.u32.totalorder %s528_s9, %s777_s4 }
   0x6   :  { %p534_p2 = pnand %p532_p1, %p529_p0 }
   0x8   :  { %537 = shalt.err (!%p534_p2)
}
   0x9   :  { %s538_s14 = scalar_lea.vmem %s38_s28, 1024  ;;  %p543_p4 = scmp.lt.s32.totalorder %s38_s28, %s38_s28 }
   0xa   :  { %p539_p3 = scmp.ne.s32.totalorder %s38_s28, %s538_s14  ;;  %p544_p5 = scmp.lt.s32.totalorder %s538_s14, %s538_s14 }
   0xc   :  { %p545_p6 = por %p544_p5, %p543_p4 }
   0xe   :  { %p546_p7 = pnand %p545_p6, %p539_p3 }
  0x10   :  { %549 = shalt.err (!%p546_p7)
}
  0x11   :  { %s623_s15 = smov 64   ;;  %s624_s16 = smov 4  }
  0x12   :  { %43 = dma.hbm_to_vmem [thread:$0]  %s777_s4, 1024, %s38_s28, [#allocation6], %s623_s15, %s623_s15, %s624_s16  }
  0x13   :  { %s625_s19 = smov [#allocation2]   ;;  %s626_s21 = smov [#allocation7]  }
  0x14   :  { %s22_s20 = sshll.u32 %s625_s19, 4  ;;  %s51_s22 = sshll.u32 %s626_s21, 4  ;;  %s23_s20 = int_to_ptr.vmem [resolvable:$true] %s22_s20  ;;  %s52_s22 = int_to_ptr.vmem [resolvable:$true] %s51_s22 }
  0x15   :  { %s550_s25 = scalar_lea.hbm %s773_s0, 128 }
  0x16   :  { %p551_p8 = scmp.ne.s32.totalorder %s773_s0, %s550_s25  ;;  %p554_p9 = scmp.lt.u32.totalorder %s550_s25, %s773_s0 }
  0x18   :  { %p556_p10 = pnand %p554_p9, %p551_p8 }
  0x1a   :  { %559 = shalt.err (!%p556_p10)
}
  0x1b   :  { %s560_s4 = scalar_lea.vmem %s23_s20, 128  ;;  %p565_p12 = scmp.lt.s32.totalorder %s23_s20, %s23_s20 }
  0x1c   :  { %p561_p11 = scmp.ne.s32.totalorder %s23_s20, %s560_s4  ;;  %p566_p13 = scmp.lt.s32.totalorder %s560_s4, %s560_s4 }
  0x1e   :  { %p567_p0 = por %p566_p13, %p565_p12 }
  0x20   :  { %p568_p1 = pnand %p567_p0, %p561_p11 }
  0x22   :  { %571 = shalt.err (!%p568_p1)
}
  0x23   :  { %25 = dma.hbm_to_vmem [thread:$0]  %s773_s0, 128, %s23_s20, [#allocation3]  }
  0x24   :  { %s572_s12 = scalar_lea.hbm %s779_s6, 1024 }
  0x25   :  { %p573_p2 = scmp.ne.s32.totalorder %s779_s6, %s572_s12  ;;  %p576_p3 = scmp.lt.u32.totalorder %s572_s12, %s779_s6 }
  0x27   :  { %p578_p4 = pnand %p576_p3, %p573_p2 }
  0x29   :  { %581 = shalt.err (!%p578_p4)
}
  0x2a   :  { %s582_s19 = scalar_lea.vmem %s52_s22, 1024  ;;  %p587_p6 = scmp.lt.s32.totalorder %s52_s22, %s52_s22 }
  0x2b   :  { %p583_p5 = scmp.ne.s32.totalorder %s52_s22, %s582_s19  ;;  %p588_p7 = scmp.lt.s32.totalorder %s582_s19, %s582_s19 }
  0x2d   :  { %p589_p8 = por %p588_p7, %p587_p6 }
  0x2f   :  { %p590_p9 = pnand %p589_p8, %p583_p5 }
  0x31   :  { %593 = shalt.err (!%p590_p9)
}
  0x32   :  { %57 = dma.hbm_to_vmem [thread:$0]  %s779_s6, 1024, %s52_s22, [#allocation6], %s623_s15, %s623_s15, %s624_s16  }
  0x33   :  { %616 = dma.done.wait [#allocation3], 128  }
  0x34   :  { %617 = vsyncadd [#allocation3], 4294967168 }
  0x35   :  { %618 = dma.done.wait [#allocation6], 2048  }
  0x36   :  { %619 = vsyncadd [#allocation6], 4294965248  ;;  %v627_v0 = vmov 0   ;;  %v628_v1 = vmov 0.0   ;;  %v74_v2 = vld [vmem:[%s774_s1] sm:$0xff]  ;;  %v507_v5 = vld [vmem:[%s775_s2 + $0x8] sm:$0xff]   ;;  %v72_v12 = vlaneseq }
  0x37   :  { %505 = vset.pattern.permute.xlu0 %v627_v0  ;;  %448 = vmatprep.subr.bf16.mxu0 %v628_v1  ;;  %v75_v3 = vadd.s32 16, %v74_v2  ;;  %v506_v4 = vld [vmem:[%s775_s2] sm:$0xff]   ;;  %vm629_vm0 = vmmov 0   ;;  %v508_v6 = vld [vmem:[#allocation5] sm:$0xff]   ;;  %v509_v7 = vld [vmem:[#allocation5 + $0x8] sm:$0xff]   ;;  %vm107_vm2 = vcmask 261120  }
  0x38   :  { %456 = vmatprep.subr.bf16.mxu1 %v628_v1  ;;  %449 = vmatpush3.bf16.msra.mxu0 %v506_v4  ;;  %v510_v8 = vld [vmem:[#allocation5 + $0x10] sm:$0xff]   ;;  %v511_v9 = vld [vmem:[#allocation5 + $0x18] sm:$0xff]   ;;  %v512_v10 = vld [vmem:[#allocation5 + $0x20] sm:$0xff]   ;;  %v73_v13 = vand.u32 127, %v72_v12 }
  0x39   :  { %77 = vperm.xlu0 %505, %v75_v3   ;;  %450 = vmatprep.subr.bf16.mxu0 %v628_v1  ;;  %v513_v11 = vld [vmem:[#allocation5 + $0x28] sm:$0xff]   ;;  %v70_v14 = vld [vmem:[#allocation2] sm:$0xff]  ;;  %v514_v20 = vld [vmem:[#allocation5 + $0x30] sm:$0xff]  }
  0x3a   :  { %452 = vmatprep.mubr.msk.bf16.mxu0 %vm629_vm0, %v628_v1  ;;  %472 = vmatprep.mubr.msk.bf16.mxu1 %vm629_vm0, %v628_v1  ;;  %v71_v16 = vpack.c.bf16 %v70_v14, %v70_v14  ;;  %v515_v21 = vld [vmem:[#allocation5 + $0x38] sm:$0xff]   ;;  %v516_v22 = vld [vmem:[#allocation7] sm:$0xff]   ;;  %v517_v23 = vld [vmem:[#allocation7 + $0x8] sm:$0xff]  }
  0x3b   :  { %457 = vmatpush3.bf16.msra.mxu1 %v508_v6  ;;  %v518_v24 = vld [vmem:[#allocation7 + $0x10] sm:$0xff]   ;;  %v519_v25 = vld [vmem:[#allocation7 + $0x18] sm:$0xff]   ;;  %v520_v26 = vld [vmem:[#allocation7 + $0x20] sm:$0xff]  }
  0x3c   :  { %451 = vmatpush3.bf16.msra.mxu0 %v507_v5  ;;  %458 = vmatprep.subr.bf16.mxu1 %v628_v1  ;;  %v521_v27 = vld [vmem:[#allocation7 + $0x28] sm:$0xff]   ;;  %v405_v28 = vld [vmem:[%s776_s3] ss:$0 sm:$0xff]  ;;  %v522_v36 = vld [vmem:[#allocation7 + $0x30] sm:$0xff]  }
  0x3d   :  { %476 = vmatprep.subr.bf16.mxu0 %v628_v1  ;;  %v523_v37 = vld [vmem:[#allocation7 + $0x38] sm:$0xff]  }
  0x3e   :  { %v409_v38 = vld [vmem:[%s778_s5] ss:$0 sm:$0xff]  ;;  %s630_s5 = smov [#allocation8]  }
  0x3f   :  { %459 = vmatpush3.bf16.msra.mxu1 %v509_v7  ;;  %v418_v46 = vld [vmem:[%s780_s7] ss:$0 sm:$0xff]  ;;  %s394_s27 = sshll.u32 %s630_s5, 4  ;;  %s395_s27 = int_to_ptr.vmem [resolvable:$true] %s394_s27 }
  0x40   :  { %460 = vmatprep.subr.bf16.mxu1 %v628_v1  ;;  %s594_s7 = scalar_lea.vmem %s395_s27, 64  ;;  %p599_p11 = scmp.lt.s32.totalorder %s395_s27, %s395_s27 }
  0x41   :  { %p595_p10 = scmp.ne.s32.totalorder %s395_s27, %s594_s7  ;;  %p600_p12 = scmp.lt.s32.totalorder %s594_s7, %s594_s7 }
  0x43   :  { %461 = vmatpush3.bf16.msra.mxu1 %v510_v8  ;;  %p601_p13 = por %p600_p12, %p599_p11 }
  0x44   :  { %462 = vmatprep.subr.bf16.mxu1 %v628_v1 }
  0x45   :  { %p602_p0 = pnand %p601_p13, %p595_p10 }
  0x47   :  { %463 = vmatpush3.bf16.msra.mxu1 %v511_v9 }
  0x48   :  { %464 = vmatprep.subr.bf16.mxu1 %v628_v1 }
  0x4b   :  { %465 = vmatpush3.bf16.msra.mxu1 %v512_v10 }
  0x4c   :  { %466 = vmatprep.subr.bf16.mxu1 %v628_v1 }
  0x4f   :  { %467 = vmatpush3.bf16.msra.mxu1 %v513_v11 }
  0x50   :  { %468 = vmatprep.subr.bf16.mxu1 %v628_v1 }
  0x53   :  { %469 = vmatpush3.bf16.msra.mxu1 %v514_v20 }
  0x54   :  { %470 = vmatprep.subr.bf16.mxu1 %v628_v1 }
  0x57   :  { %471 = vmatpush3.bf16.msra.mxu1 %v515_v21 }
  0xb8   :  { %v78_v15 = vpop.permute.xlu0 %77 }
  0xb9   :  { %vm79_vm1 = vcmp.eq.s32.totalorder %v73_v13, %v78_v15 }
  0xba   :  { %v404_v17 = vsel %vm79_vm1, 1.0, %v628_v1 }
  0xbb   :  { %v82_v18 = vpack.c.bf16 %v404_v17, %v404_v17 }
  0xbd   :  { %v83_v19 = vadd.bf16 %v82_v18, %v71_v16 }
  0xbf   :  { %453 = vmatmul.mubr.msk.bf16.vlgmr.msra.gmra.mrb[0].mxu0 %vm107_vm2, %v83_v19 }
  0xc0   :  { %492 = vmatprep.mubr.msk.bf16.mxu0 %vm629_vm0, %v628_v1  ;;  %477 = vmatpush3.bf16.msra.mxu0 %v516_v22 }
  0xc1   :  { %478 = vmatprep.subr.bf16.mxu0 %v628_v1 }
  0xc4   :  { %479 = vmatpush3.bf16.msra.mxu0 %v517_v23 }
  0xc5   :  { %480 = vmatprep.subr.bf16.mxu0 %v628_v1 }
  0xc8   :  { %481 = vmatpush3.bf16.msra.mxu0 %v518_v24 }
  0xc9   :  { %482 = vmatprep.subr.bf16.mxu0 %v628_v1 }
  0xcc   :  { %483 = vmatpush3.bf16.msra.mxu0 %v519_v25 }
  0xcd   :  { %484 = vmatprep.subr.bf16.mxu0 %v628_v1 }
  0xd0   :  { %485 = vmatpush3.bf16.msra.mxu0 %v520_v26 }
  0xd1   :  { %486 = vmatprep.subr.bf16.mxu0 %v628_v1 }
  0xd4   :  { %487 = vmatpush3.bf16.msra.mxu0 %v521_v27 }
  0xd5   :  { %488 = vmatprep.subr.bf16.mxu0 %v628_v1 }
  0xd8   :  { %489 = vmatpush3.bf16.msra.mxu0 %v522_v36 }
  0xd9   :  { %490 = vmatprep.subr.bf16.mxu0 %v628_v1 }
  0xdc   :  { %491 = vmatpush3.bf16.msra.mxu0 %v523_v37 }
 0x192   :  { %v145_v29 = vpop.f32.mrb[0].mxu0 }
 0x193   :  { %v146_v30 = vadd.f32 %v405_v28, %v145_v29  ;;  %v454_v31 = vpop.f32.mrb[1].mxu0 }
 0x194   :  { %v148_v32 = vpop.f32.mrb[2].mxu0 }
 0x195   :  { %v151_v33 = vmax.f32 %v146_v30, 0.0  ;;  %v455_v34 = vpop.f32.mrb[3].mxu0 }
 0x197   :  { %v152_v35 = vpack.c.bf16 %v151_v33, %v151_v33 }
 0x199   :  { %473 = vmatmul.mubr.bf16.vlgmr.msra.gmra.mrb[0].mxu1 %v152_v35 }
 0x26c   :  { %v258_v39 = vpop.f32.mrb[0].mxu1 }
 0x26d   :  { %v259_v40 = vadd.f32 %v409_v38, %v258_v39  ;;  %v474_v41 = vpop.f32.mrb[1].mxu1 }
 0x26e   :  { %v261_v42 = vpop.f32.mrb[2].mxu1 }
 0x26f   :  { %v264_v43 = vmax.f32 %v259_v40, 0.0  ;;  %v475_v44 = vpop.f32.mrb[3].mxu1 }
 0x271   :  { %v265_v45 = vpack.c.bf16 %v264_v43, %v264_v43 }
 0x273   :  { %493 = vmatmul.mubr.bf16.vlgmr.msra.gmra.mrb[4].mxu0 %v265_v45 }
 0x346   :  { %v371_v47 = vpop.f32.mrb[4].mxu0 }
 0x347   :  { %v372_v48 = vadd.f32 %v418_v46, %v371_v47  ;;  %v494_v49 = vpop.f32.mrb[5].mxu0 }
 0x348   :  { %v374_v50 = vpop.f32.mrb[6].mxu0 }
 0x349   :  { %377 = vmax.xlane.f32.xlu0 %v372_v48  ;;  %v495_v51 = vpop.f32.mrb[7].mxu0 }
 0x3d6   :  { %v378_v52 = vpop.xlane.xlu0 %377 }
 0x3d7   :  { %v379_v53 = vsub.f32 %v372_v48, %v378_v52 }
 0x3d9   :  { %v380_v54 = vmul.f32 1.442695, %v379_v53 }
 0x3db   :  { %524 = vpow2.f32 %v380_v54 }
 0x3e5   :  { %v525_v55 = vpop.eup %524 }
 0x3e6   :  { %382 = vadd.xlane.f32.xlu1 %v525_v55 }
 0x473   :  { %v383_v56 = vpop.xlane.xlu1 %382 }
 0x474   :  { %526 = vrcp.f32 %v383_v56 }
 0x47e   :  { %v527_v57 = vpop.eup %526 }
 0x47f   :  { %v385_v58 = vmul.f32 %v527_v57, %v525_v55 }
 0x481   :  { %v386_v59 = vpack.c.bf16 %v385_v58, %v385_v58 }
 0x483   :  { %387 = vst [vmem:[#allocation8] sm:$0xf] %v386_v59 }
 0x484   :  { %605 = shalt.err (!%p602_p0)
}
 0x485   :  { %s606_s4 = scalar_lea.hbm %s781_s8, 64 }
 0x486   :  { %p607_p1 = scmp.ne.s32.totalorder %s781_s8, %s606_s4  ;;  %p610_p2 = scmp.lt.u32.totalorder %s606_s4, %s781_s8 }
 0x488   :  { %p612_p3 = pnand %p610_p2, %p607_p1 }
 0x48a   :  { %615 = shalt.err (!%p612_p3)
}
 0x48b   :  { %397 = dma.vmem_to_hbm [thread:$0]  %s395_s27, 64, %s781_s8, [#allocation4]  }
 0x48c   :  { %620 = dma.done.wait [#allocation4], 64  }
 0x48d   :  { %621 = vsyncadd [#allocation4], 4294967232 }
 0x48e   :  { %401 = vsyncpa [#allocation3], 1 }
 0x48f   :  { %402 = vsyncpa [#allocation6], 1 }
 0x490   :  { %403 = vsyncpa [#allocation4], 1 }

</bundles_post_ra>
